<compile_context>
chip_gen: v7x
topology: tpu7x:2x2x1
jax: 0.10.0
libtpu: 0.0.40
codegen_flags: <defaults>
</compile_context>

<pallas_src>
import jax
import jax.numpy as jnp
from jax.experimental import pallas as pl
from jax.experimental.pallas import tpu as pltpu


def value_kernel(s_ref, t_ref, w1s_ref, w1t_ref, b1_ref,
                 w2_ref, b2_ref, wv_ref, bv_ref, out_ref):
    # hidden1 (concat fused: states and tasks contributions summed) + ReLU
    h1 = jnp.dot(s_ref[...], w1s_ref[...], preferred_element_type=jnp.float32)
    if t_ref.shape[1] == 1:
        # task_dim == 1: degenerate K=1 matmul -> plain VPU broadcast multiply
        h1 = h1 + t_ref[...].astype(jnp.float32) * w1t_ref[...].astype(jnp.float32)
    else:
        h1 = h1 + jnp.dot(t_ref[...], w1t_ref[...], preferred_element_type=jnp.float32)
    h1 = jnp.maximum(h1 + b1_ref[...], 0.0)

    # hidden2 + ReLU (bf16 MXU inputs, f32 accumulation; elementwise in f32 for
    # v5e portability — bf16 elementwise is an optional v6e/v7x-only tweak)
    h2 = jnp.dot(h1.astype(jnp.bfloat16), w2_ref[...],
                 preferred_element_type=jnp.float32) + b2_ref[...]
    h2 = jnp.maximum(h2, 0.0)

    # value head (output width 1): VPU multiply + lane reduce instead of a
    # 1/128-lane-utilisation MXU pass.  Store lane-dense: per-row scalars are
    # relayouted (sublane->lane, small XLU cost vs the DMA this kernel is bound
    # by) and written as one (1, 1, tile_b) row.
    v = jnp.sum(h2 * wv_ref[...], axis=-1)               # (tile_b,)
    out_ref[...] = (v + bv_ref[0]).reshape(1, 1, -1)      # lane-dense row


def value_forward(states, tasks, params, tile_b=4096):
    states = states.astype(jnp.float32)
    tasks = tasks.astype(jnp.float32)
    B, n_states = states.shape
    task_dim = tasks.shape[1]
    w1, b1, w2, b2, wv, bv = params
    H1 = w1.shape[1]
    H2 = w2.shape[1]

    # Fuse the concat: split the first-layer weight rows once at trace time.
    w1s = w1[:n_states].astype(jnp.bfloat16)            # (n_states, H1)
    w1t = w1[n_states:].astype(jnp.bfloat16)            # (task_dim, H1)
    w2b = w2.astype(jnp.bfloat16)                        # (H1, H2)
    wv_row = wv.reshape(1, H2).astype(jnp.float32)       # value head on the VPU
    bv_s = bv.reshape(1).astype(jnp.float32)             # scalar -> SMEM

    def round_up(a, m):
        return ((a + m - 1) // m) * m

    # Batch tiling: tile_b multiple of 16 (bf16 sublane packing).  If one tile
    # would cover the whole padded batch but the batch is big enough to split,
    # halve it so v7x's 2 TensorCores both get work under ("parallel",).
    tile_b = round_up(max(int(tile_b), 16), 16)
    b_ceil = round_up(B, 16)
    if tile_b >= b_ceil:
        tile_b = round_up((b_ceil + 1) // 2, 16) if b_ceil >= 32 else b_ceil
    num_tiles = (B + tile_b - 1) // tile_b
    b_pad = num_tiles * tile_b

    if b_pad != B:
        pad = b_pad - B
        # NOTE: padded rows flow through the net and are sliced off below;
        # never reduce over the padded buffer before slicing.
        states = jnp.pad(states, ((0, pad), (0, 0)))
        tasks = jnp.pad(tasks, ((0, pad), (0, 0)))

    # bf16 activations: halves the HBM bytes of the dominant input stream
    # (f32 MXU accumulation keeps the numerics close to the f32 model).
    s_bf = states.astype(jnp.bfloat16)
    t_bf = tasks.astype(jnp.bfloat16)

    resident = lambda i: (0, 0)   # constant block index -> stays in VMEM

    out = pl.pallas_call(
        value_kernel,
        out_shape=jax.ShapeDtypeStruct((num_tiles, 1, tile_b), jnp.float32),
        grid=(num_tiles,),
        in_specs=[
            # streaming per-tile activations (double-buffered by Pallas)
            pl.BlockSpec((tile_b, n_states), lambda i: (i, 0)),
            pl.BlockSpec((tile_b, task_dim), lambda i: (i, 0)),
            # weights / biases: resident across all grid steps
            pl.BlockSpec((n_states, H1), resident),
            pl.BlockSpec((task_dim, H1), resident),
            pl.BlockSpec((1, H1), resident),
            pl.BlockSpec((H1, H2), resident),
            pl.BlockSpec((1, H2), resident),
            pl.BlockSpec((1, H2), resident),
            # value-head bias: scalar in SMEM (no lane-padded VMEM block)
            pl.BlockSpec(memory_space=pltpu.MemorySpace.SMEM),
        ],
        # lane-dense output row per grid step
        out_specs=pl.BlockSpec((1, 1, tile_b), lambda i: (i, 0, 0)),
        compiler_params=pltpu.CompilerParams(
            dimension_semantics=("parallel",)),
    )(s_bf, t_bf, w1s, w1t, b1, w2b, b2, wv_row, bv_s)

    return out.reshape(b_pad, 1)[:B]


def init_params(key, n_states, task_dim, hidden_layers):
    """Matches the PyTorch initializers.

    hidden layers: kaiming_normal_ (fan_in, gain=sqrt(2)), bias zero.
    value head   : xavier_uniform_, bias zero.
    Weights stored transposed to (in, out).
    """
    sizes = [n_states + task_dim] + list(hidden_layers)
    params = []
    keys = jax.random.split(key, len(hidden_layers) + 1)
    for i, (fan_in, fan_out) in enumerate(zip(sizes[:-1], sizes[1:])):
        std = (2.0 / fan_in) ** 0.5
        w = std * jax.random.normal(keys[i], (fan_in, fan_out), dtype=jnp.float32)
        b = jnp.zeros((1, fan_out), dtype=jnp.float32)
        params.extend([w, b])
    fan_in, fan_out = sizes[-1], 1
    bound = (6.0 / (fan_in + fan_out)) ** 0.5
    wv = jax.random.uniform(keys[-1], (fan_in, fan_out), dtype=jnp.float32,
                            minval=-bound, maxval=bound)
    bv = jnp.zeros((1, fan_out), dtype=jnp.float32)
    params.extend([wv, bv])
    return tuple(params)


def reference_forward_f32(states, tasks, params):
    """Pure-f32 PyTorch-equivalent reference."""
    x = jnp.concatenate([states, tasks], axis=1).astype(jnp.float32)
    w1, b1, w2, b2, wv, bv = params
    x = jnp.maximum(x @ w1 + b1, 0.0)
    x = jnp.maximum(x @ w2 + b2, 0.0)
    return x @ wv + bv


def reference_forward_matched(states, tasks, params):
    """Reference with the same mixed-precision recipe as the kernel
    (bf16 MXU inputs, f32 accumulation, f32 VPU path for the K=1 task column
    and the value head)."""
    w1, b1, w2, b2, wv, bv = params
    n_states = states.shape[1]
    w1s = w1[:n_states].astype(jnp.bfloat16)
    w1t = w1[n_states:]
    h1 = jnp.dot(states.astype(jnp.bfloat16), w1s,
                 preferred_element_type=jnp.float32)
    if tasks.shape[1] == 1:
        h1 = h1 + (tasks.astype(jnp.bfloat16).astype(jnp.float32)
                   * w1t.astype(jnp.bfloat16).astype(jnp.float32))
    else:
        h1 = h1 + jnp.dot(tasks.astype(jnp.bfloat16), w1t.astype(jnp.bfloat16),
                          preferred_element_type=jnp.float32)
    h1 = jnp.maximum(h1 + b1, 0.0)
    h2 = jnp.dot(h1.astype(jnp.bfloat16), w2.astype(jnp.bfloat16),
                 preferred_element_type=jnp.float32) + b2
    h2 = jnp.maximum(h2, 0.0)
    return jnp.sum(h2 * wv.reshape(1, -1), axis=-1, keepdims=True) + bv.reshape(1, 1)


if __name__ == "__main__":
    # TODO(synk): pretrained-checkpoint loading (torch.load branch) is not
    # reproduced; weights are initialized in-script with matching initializers.
    n_states, task_dim = 16, 1
    hidden_layers = [32, 32]

    key = jax.random.PRNGKey(0)
    k_s, k_t, k_p, k_s2, k_t2 = jax.random.split(key, 5)
    params = init_params(k_p, n_states, task_dim, hidden_layers)

    # Small single-tile case.
    B = 8
    states = jax.random.normal(k_s, (B, n_states), dtype=jnp.float32)
    tasks = jax.random.normal(k_t, (B, task_dim), dtype=jnp.float32)
    v = jax.block_until_ready(value_forward(states, tasks, params))
    assert v.shape == (B, 1), v.shape
    v_match = reference_forward_matched(states, tasks, params)
    v_f32 = reference_forward_f32(states, tasks, params)
    assert jnp.allclose(v, v_match, atol=1e-3, rtol=1e-3), (v, v_match)
    assert jnp.allclose(v, v_f32, atol=1e-1, rtol=5e-2), (v, v_f32)

    # Multi-tile case: exercises batch padding, the >=2-grid-step split and the
    # lane-dense (num_tiles, 1, tile_b) output path.
    B2 = 100
    states2 = jax.random.normal(k_s2, (B2, n_states), dtype=jnp.float32)
    tasks2 = jax.random.normal(k_t2, (B2, task_dim), dtype=jnp.float32)
    v2 = jax.block_until_ready(value_forward(states2, tasks2, params))
    assert v2.shape == (B2, 1), v2.shape
    v2_match = reference_forward_matched(states2, tasks2, params)
    v2_f32 = reference_forward_f32(states2, tasks2, params)
    assert jnp.allclose(v2, v2_match, atol=1e-3, rtol=1e-3), (v2, v2_match)
    assert jnp.allclose(v2, v2_f32, atol=1e-1, rtol=5e-2), (v2, v2_f32)

    print("KERNEL_OK")
</pallas_src>

<mosaic_0001>
module attributes {stable_mosaic.version = 11 : i64} {
  func.func @value_kernel(%arg0: i32, %arg1: memref<16x16xbf16, #tpu.memory_space<vmem>>, %arg2: memref<16x1xbf16, #tpu.memory_space<vmem>>, %arg3: memref<16x32xbf16, #tpu.memory_space<vmem>>, %arg4: memref<1x32xbf16, #tpu.memory_space<vmem>>, %arg5: memref<1x32xf32, #tpu.memory_space<vmem>>, %arg6: memref<32x32xbf16, #tpu.memory_space<vmem>>, %arg7: memref<1x32xf32, #tpu.memory_space<vmem>>, %arg8: memref<1x32xf32, #tpu.memory_space<vmem>>, %arg9: memref<1xf32, #tpu.memory_space<smem>>, %arg10: memref<1x1x16xf32, #tpu.memory_space<vmem>>) attributes {dimension_semantics = [#tpu.dimension_semantics<parallel>], iteration_bounds = array<i64: 1>, scalar_prefetch = 0 : i64, scratch_operands = 0 : i64, tpu.core_type = #tpu.core_type<tc>, window_params = [{transform_indices = @transform_0, window_bounds = array<i64: 16, 16>}, {transform_indices = @transform_1, window_bounds = array<i64: 16, 1>}, {pipeline_mode = #tpu.pipeline_mode<synchronous>, transform_indices = @transform_2, window_bounds = array<i64: 16, 32>}, {pipeline_mode = #tpu.pipeline_mode<synchronous>, transform_indices = @transform_3, window_bounds = array<i64: 1, 32>}, {pipeline_mode = #tpu.pipeline_mode<synchronous>, transform_indices = @transform_4, window_bounds = array<i64: 1, 32>}, {pipeline_mode = #tpu.pipeline_mode<synchronous>, transform_indices = @transform_5, window_bounds = array<i64: 32, 32>}, {pipeline_mode = #tpu.pipeline_mode<synchronous>, transform_indices = @transform_6, window_bounds = array<i64: 1, 32>}, {pipeline_mode = #tpu.pipeline_mode<synchronous>, transform_indices = @transform_7, window_bounds = array<i64: 1, 32>}, {transform_indices = @transform_8, window_bounds = array<i64: 1>}, {transform_indices = @transform_9, window_bounds = array<i64: 1, 1, 16>}]} {
    %c0 = arith.constant 0 : index
    %c0_0 = arith.constant 0 : index
    %0 = vector.load %arg1[%c0, %c0_0] : memref<16x16xbf16, #tpu.memory_space<vmem>>, vector<16x16xbf16>
    %c0_1 = arith.constant 0 : index
    %c0_2 = arith.constant 0 : index
    %1 = vector.load %arg3[%c0_1, %c0_2] : memref<16x32xbf16, #tpu.memory_space<vmem>>, vector<16x32xbf16>
    %cst = arith.constant dense<0.000000e+00> : vector<16x32xf32>
    %2 = tpu.matmul %0, %1, %cst {dimension_numbers = #tpu.dot_dimension_numbers<[1], [0], [0], [1], [0, 0, 1, 1], [], []>} : vector<16x16xbf16>, vector<16x32xbf16>, vector<16x32xf32> -> vector<16x32xf32>
    %c0_3 = arith.constant 0 : index
    %c0_4 = arith.constant 0 : index
    %3 = vector.load %arg2[%c0_3, %c0_4] : memref<16x1xbf16, #tpu.memory_space<vmem>>, vector<16x1xbf16>
    %4 = arith.extf %3 : vector<16x1xbf16> to vector<16x1xf32>
    %c0_5 = arith.constant 0 : index
    %c0_6 = arith.constant 0 : index
    %5 = vector.load %arg4[%c0_5, %c0_6] : memref<1x32xbf16, #tpu.memory_space<vmem>>, vector<1x32xbf16>
    %6 = arith.extf %5 : vector<1x32xbf16> to vector<1x32xf32>
    %7 = vector.broadcast %4 : vector<16x1xf32> to vector<16x32xf32>
    %8 = vector.broadcast %6 : vector<1x32xf32> to vector<16x32xf32>
    %9 = arith.mulf %7, %8 : vector<16x32xf32>
    %10 = arith.addf %2, %9 : vector<16x32xf32>
    %c0_7 = arith.constant 0 : index
    %c0_8 = arith.constant 0 : index
    %11 = vector.load %arg5[%c0_7, %c0_8] : memref<1x32xf32, #tpu.memory_space<vmem>>, vector<1x32xf32>
    %12 = vector.broadcast %11 : vector<1x32xf32> to vector<16x32xf32>
    %13 = arith.addf %10, %12 : vector<16x32xf32>
    %cst_9 = arith.constant 0.000000e+00 : f32
    %14 = vector.broadcast %cst_9 : f32 to vector<16x32xf32>
    %15 = arith.maximumf %13, %14 : vector<16x32xf32>
    %16 = arith.truncf %15 : vector<16x32xf32> to vector<16x32xbf16>
    %c0_10 = arith.constant 0 : index
    %c0_11 = arith.constant 0 : index
    %17 = vector.load %arg6[%c0_10, %c0_11] : memref<32x32xbf16, #tpu.memory_space<vmem>>, vector<32x32xbf16>
    %cst_12 = arith.constant dense<0.000000e+00> : vector<16x32xf32>
    %18 = tpu.matmul %16, %17, %cst_12 {dimension_numbers = #tpu.dot_dimension_numbers<[1], [0], [0], [1], [0, 0, 1, 1], [], []>} : vector<16x32xbf16>, vector<32x32xbf16>, vector<16x32xf32> -> vector<16x32xf32>
    %c0_13 = arith.constant 0 : index
    %c0_14 = arith.constant 0 : index
    %19 = vector.load %arg7[%c0_13, %c0_14] : memref<1x32xf32, #tpu.memory_space<vmem>>, vector<1x32xf32>
    %20 = vector.broadcast %19 : vector<1x32xf32> to vector<16x32xf32>
    %21 = arith.addf %18, %20 : vector<16x32xf32>
    %cst_15 = arith.constant 0.000000e+00 : f32
    %22 = vector.broadcast %cst_15 : f32 to vector<16x32xf32>
    %23 = arith.maximumf %21, %22 : vector<16x32xf32>
    %c0_16 = arith.constant 0 : index
    %c0_17 = arith.constant 0 : index
    %24 = vector.load %arg8[%c0_16, %c0_17] : memref<1x32xf32, #tpu.memory_space<vmem>>, vector<1x32xf32>
    %25 = vector.broadcast %24 : vector<1x32xf32> to vector<16x32xf32>
    %26 = arith.mulf %23, %25 : vector<16x32xf32>
    %cst_18 = arith.constant dense<0.000000e+00> : vector<16xf32>
    %27 = vector.multi_reduction <add>, %26, %cst_18 [1] : vector<16x32xf32> to vector<16xf32>
    %c0_19 = arith.constant 0 : index
    %28 = memref.load %arg9[%c0_19] : memref<1xf32, #tpu.memory_space<smem>>
    %29 = vector.broadcast %28 : f32 to vector<16xf32>
    %30 = arith.addf %27, %29 : vector<16xf32>
    %31 = vector.shape_cast %30 : vector<16xf32> to vector<1x1x16xf32>
    %c0_20 = arith.constant 0 : index
    %c0_21 = arith.constant 0 : index
    %c0_22 = arith.constant 0 : index
    %32 = vector.load %arg10[%c0_20, %c0_21, %c0_22] : memref<1x1x16xf32, #tpu.memory_space<vmem>>, vector<1x1x16xf32>
    tpu.vector_store %arg10[%c0_20, %c0_21, %c0_22], %31 {strides = array<i32>} : memref<1x1x16xf32, #tpu.memory_space<vmem>>, vector<1x1x16xf32>,
    return
  }
  func.func @transform_0(%arg0: i32) -> (i32, i32) {
    %c0_i32 = arith.constant 0 : i32
    %c0_i32_0 = arith.constant 0 : i32
    return %arg0, %c0_i32 : i32, i32
  }
  func.func @transform_1(%arg0: i32) -> (i32, i32) {
    %c0_i32 = arith.constant 0 : i32
    %c0_i32_0 = arith.constant 0 : i32
    return %arg0, %c0_i32 : i32, i32
  }
  func.func @transform_2(%arg0: i32) -> (i32, i32) {
    %c0_i32 = arith.constant 0 : i32
    %c0_i32_0 = arith.constant 0 : i32
    %c0_i32_1 = arith.constant 0 : i32
    return %c0_i32, %c0_i32_0 : i32, i32
  }
  func.func @transform_3(%arg0: i32) -> (i32, i32) {
    %c0_i32 = arith.constant 0 : i32
    %c0_i32_0 = arith.constant 0 : i32
    %c0_i32_1 = arith.constant 0 : i32
    return %c0_i32, %c0_i32_0 : i32, i32
  }
  func.func @transform_4(%arg0: i32) -> (i32, i32) {
    %c0_i32 = arith.constant 0 : i32
    %c0_i32_0 = arith.constant 0 : i32
    %c0_i32_1 = arith.constant 0 : i32
    return %c0_i32, %c0_i32_0 : i32, i32
  }
  func.func @transform_5(%arg0: i32) -> (i32, i32) {
    %c0_i32 = arith.constant 0 : i32
    %c0_i32_0 = arith.constant 0 : i32
    %c0_i32_1 = arith.constant 0 : i32
    return %c0_i32, %c0_i32_0 : i32, i32
  }
  func.func @transform_6(%arg0: i32) -> (i32, i32) {
    %c0_i32 = arith.constant 0 : i32
    %c0_i32_0 = arith.constant 0 : i32
    %c0_i32_1 = arith.constant 0 : i32
    return %c0_i32, %c0_i32_0 : i32, i32
  }
  func.func @transform_7(%arg0: i32) -> (i32, i32) {
    %c0_i32 = arith.constant 0 : i32
    %c0_i32_0 = arith.constant 0 : i32
    %c0_i32_1 = arith.constant 0 : i32
    return %c0_i32, %c0_i32_0 : i32, i32
  }
  func.func @transform_8(%arg0: i32) -> i32 {
    %c0_i32 = arith.constant 0 : i32
    %c0_i32_0 = arith.constant 0 : i32
    return %c0_i32 : i32
  }
  func.func @transform_9(%arg0: i32) -> (i32, i32, i32) {
    %c0_i32 = arith.constant 0 : i32
    %c0_i32_0 = arith.constant 0 : i32
    %c0_i32_1 = arith.constant 0 : i32
    return %arg0, %c0_i32, %c0_i32_0 : i32, i32, i32
  }
}

</mosaic_0001>

<bundles_post_ra>
// kernel: tpu_custom_call.1
= control target key start
LH: loop header
LB: loop body
LE: loop exit
PB: predicated region body
PF: predicated region fallthrough
CT: control target
= control target key end

     0   :  { %15 = vsyncpa [#allocation4], 0  ;;  %s473_s0 = inlined_call_operand.vmem [shape: bf16[16,16], index: 0, kind: input, shape index: {}]   ;;  %s474_s1 = inlined_call_operand.vmem [shape: bf16[16,1], index: 1, kind: input, shape index: {}]   ;;  %s475_s2 = inlined_call_operand.hbm [shape: bf16[16,32], index: 2, kind: input, shape index: {}]   ;;  %s476_s3 = inlined_call_operand.vmem [shape: bf16[1,32], index: 3, kind: input, shape index: {}]   ;;  %s477_s4 = inlined_call_operand.vmem [shape: f32[1,32], index: 4, kind: input, shape index: {}]   ;;  %s478_s5 = inlined_call_operand.vmem [shape: bf16[32,32], index: 5, kind: input, shape index: {}]   ;;  %s479_s6 = inlined_call_operand.vmem [shape: f32[1,32], index: 6, kind: input, shape index: {}]   ;;  %s480_s7 = inlined_call_operand.vmem [shape: f32[1,32], index: 7, kind: input, shape index: {}]   ;;  %s481_s8 = inlined_call_operand.<no memory space> [shape: f32[1], index: 8, kind: input, shape index: {}]   ;;  %s482_s9 = inlined_call_operand.hbm [shape: f32[1,1,16], index: 9, kind: output, shape index: {}]  }
   0x1   :  { %16 = vsyncpa [#allocation5], 0  ;;  %s362_s30 = smov [#allocation3]   ;;  %s314_s13 = scalar_lea.hbm %s475_s2, 128 }
   0x2   :  { %s26_s10 = sshll.u32 %s362_s30, 4  ;;  %p315_p0 = scmp.ne.s32.totalorder %s475_s2, %s314_s13  ;;  %s27_s10 = int_to_ptr.vmem [resolvable:$true] %s26_s10 }
   0x3   :  { %p318_p1 = scmp.lt.u32.totalorder %s314_s13, %s475_s2 }
   0x5   :  { %p320_p2 = pnand %p318_p1, %p315_p0 }
   0x7   :  { %323 = shalt.err (!%p320_p2)
}
   0x8   :  { %s324_s18 = scalar_lea.vmem %s27_s10, 128  ;;  %p329_p4 = scmp.lt.s32.totalorder %s27_s10, %s27_s10 }
   0x9   :  { %p325_p3 = scmp.ne.s32.totalorder %s27_s10, %s324_s18  ;;  %p330_p5 = scmp.lt.s32.totalorder %s324_s18, %s324_s18 }
   0xb   :  { %p331_p6 = por %p330_p5, %p329_p4 }
   0xd   :  { %p332_p7 = pnand %p331_p6, %p325_p3 }
   0xf   :  { %335 = shalt.err (!%p332_p7)
}
  0x10   :  { %s363_s19 = smov 64   ;;  %s364_s20 = smov 4  }
  0x11   :  { %32 = dma.hbm_to_vmem [thread:$0]  %s475_s2, 128, %s27_s10, [#allocation4], %s363_s19, %s363_s19, %s364_s20  }
  0x12   :  { %358 = dma.done.wait [#allocation4], 128  }
  0x13   :  { %359 = vsyncadd [#allocation4], 4294967168  ;;  %v365_v0 = vmov 0.0   ;;  %vm366_vm0 = vmmov 0   ;;  %v367_v1 = vmov 0   ;;  %v310_v2 = vld [vmem:[#allocation3] sm:$0xff]   ;;  %v69_v10 = vlaneseq }
  0x14   :  { %283 = vmatprep.subr.bf16.mxu0 %v365_v0  ;;  %285 = vmatprep.mubr.msk.bf16.mxu0 %vm366_vm0, %v365_v0  ;;  %v311_v3 = vld [vmem:[%s473_s0] sm:$0xff]   ;;  %vm86_vm1 = vcmask 130048   ;;  %v313_v9 = vld [vmem:[%s478_s5 + $0x8] sm:$0xff]   ;;  %vm166_vm2 = vcmask 261120   ;;  %v229_v49 = vstv %s481_s8  ;;  %vm245_vm3 = vcmask 130112  }
  0x15   :  { %304 = vset.pattern.permute.xlu0 %v367_v1  ;;  %289 = vmatprep.subr.bf16.mxu1 %v365_v0  ;;  %v275_v4 = vld [vmem:[%s474_s1] sm:$0xff]   ;;  %v70_v11 = vshrl.u32 %v69_v10, 7  ;;  %v235_v47 = vand.u32 127, %v69_v10  ;;  %vm248_vm4 = vcmask 122880  }
  0x16   :  { %293 = vmatprep.mubr.msk.bf16.mxu1 %vm366_vm0, %v365_v0  ;;  %284 = vmatpush3.bf16.msra.mxu0 %v310_v2  ;;  %v276_v5 = vunpack.c.l.bf16 %v275_v4  ;;  %v277_v6 = vunpack.c.h.bf16 %v275_v4  ;;  %v312_v8 = vld [vmem:[%s478_s5] sm:$0xff]  }
  0x17   :  { %290 = vmatpush3.bf16.msra.mxu1 %v312_v8  ;;  %v57_v12 = vld [vmem:[%s476_s3] sm:$0x1]  ;;  %v71_v14 = vsub.s32 0, %v70_v11  ;;  %v240_v48 = vadd.s32 4294967288, %v235_v47  ;;  %v238_v51 = vsub.s32 %v235_v47, %v70_v11 }
  0x18   :  { %v305_v7 = vpack.i.bf16 %v277_v6, %v276_v5  ;;  %291 = vmatprep.subr.bf16.mxu1 %v365_v0  ;;  %v58_v13 = vunpack.c.l.bf16 %v57_v12  ;;  %v268_v22 = vld [vmem:[%s477_s4] ss:$0 sm:$0xff] }
  0x19   :  { %286 = vmatmul.mubr.msk.bf16.vlgmr.msra.gmra.mrb[0].mxu0 %vm86_vm1, %v311_v3  ;;  %v269_v33 = vld [vmem:[%s479_s6] ss:$0 sm:$0xff]  ;;  %v243_v53 = vsub.s32 %v240_v48, %v70_v11 }
  0x1a   :  { %306 = vperm.xlu0 %304, %v305_v7   ;;  %v72_v17 = vrot.slane %v58_v13, %v71_v14  ;;  %v273_v38 = vld [vmem:[%s480_s7] ss:$0 sm:$0xff]  ;;  %s368_s7 = smov [#allocation6]  }
  0x1b   :  { %292 = vmatpush3.bf16.msra.mxu1 %v313_v9  ;;  %s256_s13 = sshll.u32 %s368_s7, 4  ;;  %s257_s13 = int_to_ptr.vmem [resolvable:$true] %s256_s13 }
  0x1c   :  { %s336_s14 = scalar_lea.vmem %s257_s13, 16  ;;  %s340_s15 = scalar_lea.vmem %s257_s13, 32 }
  0x1d   :  { %p337_p8 = scmp.ne.s32.totalorder %s257_s13, %s336_s14  ;;  %p341_p9 = scmp.lt.s32.totalorder %s257_s13, %s257_s13 }
  0x1e   :  { %p342_p10 = scmp.lt.s32.totalorder %s340_s15, %s336_s14 }
  0x20   :  { %p343_p11 = por %p342_p10, %p341_p9 }
  0x22   :  { %p344_p12 = pnand %p343_p11, %p337_p8 }
  0x99   :  { %v307_v15 = vpop.permute.xlu0 %306 }
  0x9a   :  { %v308_v16 = vunpack.i.l.bf16 %v307_v15  ;;  %v309_v18 = vunpack.i.h.bf16 %v307_v15 }
  0x9c   :  { %v73_v19 = vmul.f32 %v308_v16, %v72_v17  ;;  %v74_v20 = vmul.f32 %v309_v18, %v72_v17 }
  0xec   :  { %v124_v21 = vpop.f32.mrb[0].mxu0 }
  0xed   :  { %v125_v23 = vadd.f32 %v124_v21, %v73_v19  ;;  %v287_v24 = vpop.f32.mrb[1].mxu0 }
  0xee   :  { %v127_v25 = vpop.f32.mrb[2].mxu0 }
  0xef   :  { %v138_v26 = vadd.f32 %v268_v22, %v125_v23  ;;  %v128_v27 = vadd.f32 %v127_v25, %v74_v20  ;;  %v288_v28 = vpop.f32.mrb[3].mxu0 }
  0xf1   :  { %v139_v29 = vadd.f32 %v268_v22, %v128_v27  ;;  %v140_v30 = vmax.f32 %v138_v26, 0.0 }
  0xf3   :  { %v141_v31 = vmax.f32 %v139_v29, 0.0 }
  0xf5   :  { %v142_v32 = vpack.c.bf16 %v141_v31, %v140_v30 }
  0xf7   :  { %294 = vmatmul.mubr.msk.bf16.vlgmr.msra.gmra.mrb[0].mxu1 %vm166_vm2, %v142_v32 }
 0x1ca   :  { %v204_v34 = vpop.f32.mrb[0].mxu1 }
 0x1cb   :  { %v205_v35 = vadd.f32 %v269_v33, %v204_v34  ;;  %v295_v36 = vpop.f32.mrb[1].mxu1 }
 0x1cc   :  { %v207_v37 = vpop.f32.mrb[2].mxu1 }
 0x1cd   :  { %v211_v39 = vmax.f32 %v205_v35, 0.0  ;;  %v208_v40 = vadd.f32 %v269_v33, %v207_v37  ;;  %v296_v41 = vpop.f32.mrb[3].mxu1 }
 0x1cf   :  { %v212_v42 = vmax.f32 %v208_v40, 0.0  ;;  %v220_v43 = vmul.f32 %v273_v38, %v211_v39 }
 0x1d1   :  { %v222_v44 = vsel %vm166_vm2, %v220_v43, 0.0  ;;  %v221_v45 = vmul.f32 %v273_v38, %v212_v42 }
 0x1d2   :  { %223 = vadd.xlane.f32.xlu0 %v222_v44 }
 0x1d3   :  { %v225_v46 = vsel %vm166_vm2, %v221_v45, 0.0 }
 0x1d4   :  { %226 = vadd.xlane.f32.xlu1 %v225_v46 }
 0x25f   :  { %v224_v50 = vpop.xlane.xlu0 %223 }
 0x260   :  { %v230_v52 = vadd.f32 %v229_v49, %v224_v50 }
 0x261   :  { %v227_v54 = vpop.xlane.xlu1 %226 }
 0x262   :  { %v231_v55 = vadd.f32 %v229_v49, %v227_v54  ;;  %v239_v56 = vrot.slane %v230_v52, %v238_v51 }
 0x264   :  { %v244_v57 = vrot.slane %v231_v55, %v243_v53 }
 0x266   :  { %v246_v58 = vsel %vm245_vm3, %v244_v57, %v239_v56 }
 0x267   :  { %249 = vst.msk [vmem:[#allocation6] sm:$0x1] %vm248_vm4, %v246_v58 }
 0x268   :  { %347 = shalt.err (!%p344_p12)
}
 0x269   :  { %s348_s17 = scalar_lea.hbm %s482_s9, 16 }
 0x26a   :  { %p349_p13 = scmp.ne.s32.totalorder %s482_s9, %s348_s17  ;;  %p352_p0 = scmp.lt.u32.totalorder %s348_s17, %s482_s9 }
 0x26c   :  { %p354_p1 = pnand %p352_p0, %p349_p13 }
 0x26e   :  { %357 = shalt.err (!%p354_p1)
}
 0x26f   :  { %259 = dma.vmem_to_hbm [thread:$0]  %s257_s13, 16, %s482_s9, [#allocation5]  }
 0x270   :  { %360 = dma.done.wait [#allocation5], 16  }
 0x271   :  { %361 = vsyncadd [#allocation5], 4294967280 }
 0x272   :  { %263 = vsyncpa [#allocation4], 1 }
 0x273   :  { %264 = vsyncpa [#allocation5], 1 }

</bundles_post_ra>
